<compile_context>
chip_gen: v7x
topology: tpu7x:2x2x1
jax: 0.10.0
libtpu: 0.0.40
codegen_flags: <defaults>
</compile_context>

<pallas_src>
import jax
import jax.numpy as jnp
from jax.experimental import pallas as pl
from jax.experimental.pallas import tpu as pltpu


def _to2d_kernel(x_ref, o_ref):
    # x_ref: (tile_r, L) block of pooling-bin rows; o_ref: (1, tile_r).
    m = jnp.mean(x_ref[...], axis=-1, dtype=jnp.float32)          # (tile_r,)  f32 accumulate
    o_ref[...] = jax.nn.sigmoid(m)[None, :].astype(o_ref.dtype)   # lane-dense store


def to2d(x):
    """Pallas implementation of To2D.forward.  x: (N, C, H, W) -> (N, C, 2, 1)."""
    n, c, h, w = x.shape
    h_half = (h + 1) // 2  # rows per adaptive bin; bins overlap by one row when H is odd

    # --- wrapper-side layout glue: one lane-dense row per pooling bin --------
    if h % 2 == 0:
        xb = x.reshape(n * c * 2, h_half * w)                     # pure reshape, no copy
    else:
        top = x[:, :, :h_half, :]                                 # rows [0, ceil(H/2))
        bot = x[:, :, h - h_half:, :]                             # rows [floor(H/2), H)
        xb = jnp.stack([top, bot], axis=2).reshape(n * c * 2, h_half * w)

    r, l = xb.shape
    itemsize = jnp.dtype(x.dtype).itemsize

    # Row tile: multiple of 128 rows (keeps the lane-dense (1, tile_r) output
    # block legal under the (8, 128) rule), ~4 MiB per input tile so two
    # double-buffered tiles stay far below the 32 MiB scoped-VMEM default on
    # every generation (including v7x's 64 MiB physical VMEM).
    tile_r = max(128, ((4 * 1024 * 1024) // max(1, l * itemsize)) // 128 * 128)
    if tile_r >= r:
        tile_r = r                                                # single full-dim block

    grid = (pl.cdiv(r, tile_r),)
    cost = pl.CostEstimate(
        flops=r * (l + 4),
        transcendentals=r,
        bytes_accessed=r * l * itemsize + r * itemsize,
    )

    out = pl.pallas_call(
        _to2d_kernel,
        out_shape=jax.ShapeDtypeStruct((1, r), x.dtype),
        grid=grid,
        in_specs=[pl.BlockSpec((tile_r, l), lambda i: (i, 0))],
        out_specs=pl.BlockSpec((1, tile_r), lambda i: (0, i)),
        compiler_params=pltpu.CompilerParams(dimension_semantics=("parallel",)),
        cost_estimate=cost,
    )(xb)

    # trailing (2, 1) dims of adaptive_avg_pool2d(x, (2, 1)) — pure reshape glue
    return out.reshape(n, c, 2, 1)


if __name__ == "__main__":
    key = jax.random.PRNGKey(0)
    # small NCHW input consistent with a conv feature map: batch=2, channels=4, 16x16
    x = jax.random.normal(key, (2, 4, 16, 16), dtype=jnp.float32)

    z = to2d(x)
    jax.block_until_ready(z)

    # plain-JAX reference of the same semantics (H=16 even -> halves don't overlap)
    row_mean = jnp.mean(x, axis=-1)
    ref = jnp.stack(
        [jnp.mean(row_mean[:, :, :8], axis=-1),
         jnp.mean(row_mean[:, :, 8:], axis=-1)],
        axis=-1,
    )[..., None]
    ref = jax.nn.sigmoid(ref)

    assert z.shape == (2, 4, 2, 1), z.shape
    assert z.dtype == x.dtype
    assert jnp.allclose(z, ref, atol=1e-6), float(jnp.max(jnp.abs(z - ref)))
    print("KERNEL_OK")
</pallas_src>

<mosaic_0001>
module attributes {stable_mosaic.version = 11 : i64} {
  func.func @_to2d_kernel(%arg0: i32, %arg1: memref<16x128xf32, #tpu.memory_space<vmem>>, %arg2: memref<1x16xf32, #tpu.memory_space<vmem>>) attributes {dimension_semantics = [#tpu.dimension_semantics<parallel>], iteration_bounds = array<i64: 1>, scalar_prefetch = 0 : i64, scratch_operands = 0 : i64, tpu.core_type = #tpu.core_type<tc>, window_params = [{transform_indices = @transform_0, window_bounds = array<i64: 16, 128>}, {transform_indices = @transform_1, window_bounds = array<i64: 1, 16>}]} {
    %c0 = arith.constant 0 : index
    %c0_0 = arith.constant 0 : index
    %0 = vector.load %arg1[%c0, %c0_0] : memref<16x128xf32, #tpu.memory_space<vmem>>, vector<16x128xf32>
    %cst = arith.constant dense<0.000000e+00> : vector<16xf32>
    %1 = vector.multi_reduction <add>, %0, %cst [1] : vector<16x128xf32> to vector<16xf32>
    %cst_1 = arith.constant 1.280000e+02 : f32
    %2 = vector.broadcast %cst_1 : f32 to vector<16xf32>
    %3 = arith.divf %1, %2 : vector<16xf32>
    %4 = arith.negf %3 : vector<16xf32>
    %5 = math.exp %4 : vector<16xf32>
    %cst_2 = arith.constant 1.000000e+00 : f32
    %6 = vector.broadcast %cst_2 : f32 to vector<16xf32>
    %7 = arith.addf %6, %5 : vector<16xf32>
    %8 = arith.divf %6, %7 : vector<16xf32>
    %9 = vector.shape_cast %8 : vector<16xf32> to vector<1x16xf32>
    %c0_3 = arith.constant 0 : index
    %c0_4 = arith.constant 0 : index
    %10 = vector.load %arg2[%c0_3, %c0_4] : memref<1x16xf32, #tpu.memory_space<vmem>>, vector<1x16xf32>
    tpu.vector_store %arg2[%c0_3, %c0_4], %9 {strides = array<i32>} : memref<1x16xf32, #tpu.memory_space<vmem>>, vector<1x16xf32>,
    return
  }
  func.func @transform_0(%arg0: i32) -> (i32, i32) {
    %c0_i32 = arith.constant 0 : i32
    %c0_i32_0 = arith.constant 0 : i32
    return %arg0, %c0_i32 : i32, i32
  }
  func.func @transform_1(%arg0: i32) -> (i32, i32) {
    %c0_i32 = arith.constant 0 : i32
    %c0_i32_0 = arith.constant 0 : i32
    return %c0_i32, %arg0 : i32, i32
  }
}

</mosaic_0001>

<bundles_post_ra>
// kernel: tpu_custom_call.1
= control target key start
LH: loop header
LB: loop body
LE: loop exit
PB: predicated region body
PF: predicated region fallthrough
CT: control target
= control target key end

     0   :  { %6 = vsyncpa [#allocation3], 0  ;;  %s177_s0 = inlined_call_operand.hbm [shape: f32[16,128], index: 0, kind: input, shape index: {}]   ;;  %s178_s1 = inlined_call_operand.hbm [shape: f32[1,16], index: 1, kind: output, shape index: {}]  }
   0x1   :  { %7 = vsyncpa [#allocation4], 0  ;;  %s139_s6 = smov [#allocation2]   ;;  %s91_s10 = scalar_lea.hbm %s177_s0, 256 }
   0x2   :  { %s13_s7 = sshll.u32 %s139_s6, 4  ;;  %p92_p0 = scmp.ne.s32.totalorder %s177_s0, %s91_s10  ;;  %s14_s7 = int_to_ptr.vmem [resolvable:$true] %s13_s7 }
   0x3   :  { %p95_p1 = scmp.lt.u32.totalorder %s91_s10, %s177_s0 }
   0x5   :  { %p97_p2 = pnand %p95_p1, %p92_p0 }
   0x7   :  { %100 = shalt.err (!%p97_p2)
}
   0x8   :  { %s101_s15 = scalar_lea.vmem %s14_s7, 256  ;;  %p106_p4 = scmp.lt.s32.totalorder %s14_s7, %s14_s7 }
   0x9   :  { %p102_p3 = scmp.ne.s32.totalorder %s14_s7, %s101_s15  ;;  %p107_p5 = scmp.lt.s32.totalorder %s101_s15, %s101_s15 }
   0xb   :  { %p108_p6 = por %p107_p5, %p106_p4 }
   0xd   :  { %p109_p7 = pnand %p108_p6, %p102_p3 }
   0xf   :  { %112 = shalt.err (!%p109_p7)
}
  0x10   :  { %s140_s16 = smov 128   ;;  %s141_s17 = smov 8  }
  0x11   :  { %19 = dma.hbm_to_vmem [thread:$0]  %s177_s0, 256, %s14_s7, [#allocation3], %s140_s16, %s140_s16, %s141_s17  }
  0x12   :  { %135 = dma.done.wait [#allocation3], 256  }
  0x13   :  { %136 = vsyncadd [#allocation3], 4294967040  ;;  %v23_v0 = vld [vmem:[#allocation2] sm:$0xff]  ;;  %v24_v1 = vld [vmem:[#allocation2 + $0x8] sm:$0xff]  ;;  %v46_v11 = vlaneseq  ;;  %s142_s0 = smov [#allocation5]   ;;  %vm57_vm0 = vcmask 130112  }
  0x14   :  { %25 = vadd.xlane.f32.xlu0 %v23_v0  ;;  %s68_s20 = sshll.u32 %s142_s0, 4  ;;  %vm60_vm1 = vcmask 122880   ;;  %s69_s20 = int_to_ptr.vmem [resolvable:$true] %s68_s20 }
  0x15   :  { %v47_v13 = vand.u32 127, %v46_v11  ;;  %v49_v14 = vshrl.u32 %v46_v11, 7  ;;  %s113_s21 = scalar_lea.vmem %s69_s20, 16  ;;  %s117_s22 = scalar_lea.vmem %s69_s20, 32 }
  0x16   :  { %p114_p8 = scmp.ne.s32.totalorder %s69_s20, %s113_s21  ;;  %p118_p9 = scmp.lt.s32.totalorder %s69_s20, %s69_s20 }
  0x17   :  { %v52_v15 = vadd.s32 4294967288, %v47_v13  ;;  %v50_v16 = vsub.s32 %v47_v13, %v49_v14  ;;  %p119_p10 = scmp.lt.s32.totalorder %s117_s22, %s113_s21 }
  0x18   :  { %27 = vadd.xlane.f32.xlu0 %v24_v1 }
  0x19   :  { %v55_v17 = vsub.s32 %v52_v15, %v49_v14  ;;  %p120_p11 = por %p119_p10, %p118_p9 }
  0x1b   :  { %p121_p12 = pnand %p120_p11, %p114_p8 }
  0xa1   :  { %v26_v2 = vpop.xlane.xlu0 %25 }
  0xa2   :  { %v77_v3 = vmul.f32 -0.0078125, %v26_v2 }
  0xa4   :  { %v34_v4 = vmul.f32 1.442695, %v77_v3 }
  0xa5   :  { %v28_v5 = vpop.xlane.xlu0 %27 }
  0xa6   :  { %83 = vpow2.f32 %v34_v4  ;;  %v78_v6 = vmul.f32 -0.0078125, %v28_v5 }
  0xa8   :  { %v36_v7 = vmul.f32 1.442695, %v78_v6 }
  0xaa   :  { %85 = vpow2.f32 %v36_v7 }
  0xb0   :  { %v84_v8 = vpop.eup %83 }
  0xb1   :  { %v38_v9 = vadd.f32 1.0, %v84_v8 }
  0xb3   :  { %87 = vrcp.f32 %v38_v9 }
  0xb4   :  { %v86_v10 = vpop.eup %85 }
  0xb5   :  { %v39_v12 = vadd.f32 1.0, %v86_v10 }
  0xb7   :  { %89 = vrcp.f32 %v39_v12 }
  0xbd   :  { %v88_v18 = vpop.eup %87 }
  0xbe   :  { %v51_v20 = vrot.slane %v88_v18, %v50_v16 }
  0xc1   :  { %v90_v19 = vpop.eup %89 }
  0xc2   :  { %v56_v21 = vrot.slane %v90_v19, %v55_v17 }
  0xc4   :  { %v58_v22 = vsel %vm57_vm0, %v56_v21, %v51_v20 }
  0xc5   :  { %61 = vst.msk [vmem:[#allocation5] sm:$0x1] %vm60_vm1, %v58_v22 }
  0xc6   :  { %124 = shalt.err (!%p121_p12)
}
  0xc7   :  { %s125_s25 = scalar_lea.hbm %s178_s1, 16 }
  0xc8   :  { %p126_p13 = scmp.ne.s32.totalorder %s178_s1, %s125_s25  ;;  %p129_p0 = scmp.lt.u32.totalorder %s125_s25, %s178_s1 }
  0xca   :  { %p131_p1 = pnand %p129_p0, %p126_p13 }
  0xcc   :  { %134 = shalt.err (!%p131_p1)
}
  0xcd   :  { %71 = dma.vmem_to_hbm [thread:$0]  %s69_s20, 16, %s178_s1, [#allocation4]  }
  0xce   :  { %137 = dma.done.wait [#allocation4], 16  }
  0xcf   :  { %138 = vsyncadd [#allocation4], 4294967280 }
  0xd0   :  { %75 = vsyncpa [#allocation3], 1 }
  0xd1   :  { %76 = vsyncpa [#allocation4], 1 }

</bundles_post_ra>
